<compile_context>
chip_gen: v7x
topology: tpu7x:2x2x1
jax: 0.10.0
libtpu: 0.0.40
codegen_flags: <defaults>
</compile_context>

<pallas_src>
import jax
import jax.numpy as jnp
from jax.experimental import pallas as pl
from jax.experimental.pallas import tpu as pltpu

LANE = 128
HIDDEN = 40


def _round_up(n, m):
    return ((n + m - 1) // m) * m


def mlp_kernel(x_ref, w1_ref, b1_ref, w2_ref, b2_ref, w3_ref, b3_ref, o_ref):
    # x_ref : (1, TB)      batch on lanes
    # w1_ref: (40, 1)      b1_ref: (40, 1)
    # w2_ref: (40, 40)     b2_ref: (40, 1)
    # w3_ref: (40, 1)      b3_ref: (1, 1)
    # o_ref : (1, TB)
    x = x_ref[...]                                               # (1, TB)

    # Layer 1: Linear(1, 40) — K=1 contraction -> VPU broadcast mul + add.
    h1 = jnp.maximum(w1_ref[...] * x + b1_ref[...], 0.0)         # (40, TB)

    # Layer 2: Linear(40, 40) — the only real MXU matmul: W2 @ h1.
    h2 = jnp.dot(w2_ref[...], h1, preferred_element_type=jnp.float32)
    h2 = jnp.maximum(h2 + b2_ref[...], 0.0)                      # (40, TB)

    # Layer 3: Linear(40, 1) — N=1 -> elementwise mul + sublane reduce (XLU).
    out = jnp.sum(w3_ref[...] * h2, axis=0, keepdims=True) + b3_ref[...]  # (1, TB)
    o_ref[...] = out.astype(o_ref.dtype)


def prepare_params(params):
    """One-time conversion from PyTorch nn.Linear layout to kernel layout.

    Call once and reuse the result across the MAML inner loop; avoids emitting
    transpose/reshape XLA ops on every forward call."""
    return (
        params["w1"],                      # (40, 1)  (out, in) used as-is
        params["b1"].reshape(HIDDEN, 1),   # (40, 1)  column for lane-broadcast
        params["w2"],                      # (40, 40) (out, in) used as-is: W @ x
        params["b2"].reshape(HIDDEN, 1),   # (40, 1)
        params["w3"].reshape(HIDDEN, 1),   # (1, 40) -> (40, 1) column
        params["b3"].reshape(1, 1),        # (1, 1)
    )


def maml_forward(x, kparams, *, batch_tile=512):
    """Fused MLP forward.

    x       : (B, 1) float32 — B may be many stacked tasks / inner-loop samples;
              fusing them into one call amortizes the pallas_call overhead.
    kparams : output of prepare_params().
    """
    w1, b1, w2, b2, w3, b3 = kparams
    B = x.shape[0]

    # Batch tile on lanes: multiple of 128 (or the whole padded batch if small).
    TB = min(batch_tile, _round_up(B, LANE))
    Bp = _round_up(B, TB)

    x_row = x.reshape(1, B)                      # batch -> lane axis (free reshape)
    if Bp != B:
        x_row = jnp.pad(x_row, ((0, 0), (0, Bp - B)))

    grid = (Bp // TB,)
    const = lambda i: (0, 0)                     # weights resident across all steps

    out_row = pl.pallas_call(
        mlp_kernel,
        out_shape=jax.ShapeDtypeStruct((1, Bp), jnp.float32),
        grid=grid,
        in_specs=[
            pl.BlockSpec((1, TB), lambda i: (0, i)),   # x tile (batch on lanes)
            pl.BlockSpec(w1.shape, const),
            pl.BlockSpec(b1.shape, const),
            pl.BlockSpec(w2.shape, const),
            pl.BlockSpec(b2.shape, const),
            pl.BlockSpec(w3.shape, const),
            pl.BlockSpec(b3.shape, const),
        ],
        out_specs=pl.BlockSpec((1, TB), lambda i: (0, i)),
        compiler_params=pltpu.CompilerParams(
            dimension_semantics=("parallel",),         # 2x on v7x, no-op on v5e/v6e
        ),
    )(x_row, w1, b1, w2, b2, w3, b3)

    return out_row[:, :B].reshape(B, 1)


def init_params(key):
    """Deterministic init matching nn.Linear default (uniform +-1/sqrt(fan_in)),
    stored in PyTorch layout (out_features, in_features)."""
    ks = jax.random.split(key, 6)

    def u(k, shape, fan_in):
        bound = 1.0 / jnp.sqrt(fan_in)
        return jax.random.uniform(k, shape, jnp.float32, -bound, bound)

    return {
        "w1": u(ks[0], (40, 1), 1.0),
        "b1": u(ks[1], (40,), 1.0),
        "w2": u(ks[2], (40, 40), 40.0),
        "b2": u(ks[3], (40,), 40.0),
        "w3": u(ks[4], (1, 40), 40.0),
        "b3": u(ks[5], (1,), 40.0),
    }


def maml_forward_ref(x, p):
    """Pure-JAX reference of the PyTorch forward (row-major, PyTorch layout)."""
    h = jnp.maximum(x @ p["w1"].T + p["b1"], 0.0)
    h = jnp.maximum(h @ p["w2"].T + p["b2"], 0.0)
    return h @ p["w3"].T + p["b3"]


if __name__ == "__main__":
    key = jax.random.PRNGKey(0)
    pkey, xkey1, xkey2 = jax.random.split(key, 3)

    params = init_params(pkey)
    kparams = prepare_params(params)   # one-time layout conversion

    # Case 1: canonical sine-regression MAML batch (B=8) — single grid step.
    x1 = jax.random.uniform(xkey1, (8, 1), jnp.float32, -5.0, 5.0)
    y1 = jax.block_until_ready(maml_forward(x1, kparams))
    assert y1.shape == (8, 1)
    assert jnp.allclose(y1, maml_forward_ref(x1, params), atol=1e-4, rtol=1e-4), \
        "mismatch vs reference (B=8)"

    # Case 2: many stacked samples fused into one call — multi-tile grid + lane padding.
    x2 = jax.random.uniform(xkey2, (300, 1), jnp.float32, -5.0, 5.0)
    y2 = jax.block_until_ready(maml_forward(x2, kparams, batch_tile=128))
    assert y2.shape == (300, 1)
    assert jnp.allclose(y2, maml_forward_ref(x2, params), atol=1e-4, rtol=1e-4), \
        "mismatch vs reference (B=300, tiled)"

    print("KERNEL_OK")
</pallas_src>

<mosaic_0001>
module attributes {stable_mosaic.version = 11 : i64} {
  func.func @mlp_kernel(%arg0: i32, %arg1: memref<1x128xf32, #tpu.memory_space<vmem>>, %arg2: memref<40x1xf32, #tpu.memory_space<vmem>>, %arg3: memref<40x1xf32, #tpu.memory_space<vmem>>, %arg4: memref<40x40xf32, #tpu.memory_space<vmem>>, %arg5: memref<40x1xf32, #tpu.memory_space<vmem>>, %arg6: memref<40x1xf32, #tpu.memory_space<vmem>>, %arg7: memref<1x1xf32, #tpu.memory_space<vmem>>, %arg8: memref<1x128xf32, #tpu.memory_space<vmem>>) attributes {dimension_semantics = [#tpu.dimension_semantics<parallel>], iteration_bounds = array<i64: 1>, scalar_prefetch = 0 : i64, scratch_operands = 0 : i64, tpu.core_type = #tpu.core_type<tc>, window_params = [{transform_indices = @transform_0, window_bounds = array<i64: 1, 128>}, {pipeline_mode = #tpu.pipeline_mode<synchronous>, transform_indices = @transform_1, window_bounds = array<i64: 40, 1>}, {pipeline_mode = #tpu.pipeline_mode<synchronous>, transform_indices = @transform_2, window_bounds = array<i64: 40, 1>}, {pipeline_mode = #tpu.pipeline_mode<synchronous>, transform_indices = @transform_3, window_bounds = array<i64: 40, 40>}, {pipeline_mode = #tpu.pipeline_mode<synchronous>, transform_indices = @transform_4, window_bounds = array<i64: 40, 1>}, {pipeline_mode = #tpu.pipeline_mode<synchronous>, transform_indices = @transform_5, window_bounds = array<i64: 40, 1>}, {pipeline_mode = #tpu.pipeline_mode<synchronous>, transform_indices = @transform_6, window_bounds = array<i64: 1, 1>}, {transform_indices = @transform_7, window_bounds = array<i64: 1, 128>}]} {
    %c0 = arith.constant 0 : index
    %c0_0 = arith.constant 0 : index
    %0 = vector.load %arg1[%c0, %c0_0] : memref<1x128xf32, #tpu.memory_space<vmem>>, vector<1x128xf32>
    %c0_1 = arith.constant 0 : index
    %c0_2 = arith.constant 0 : index
    %1 = vector.load %arg2[%c0_1, %c0_2] : memref<40x1xf32, #tpu.memory_space<vmem>>, vector<40x1xf32>
    %2 = vector.broadcast %1 : vector<40x1xf32> to vector<40x128xf32>
    %3 = vector.broadcast %0 : vector<1x128xf32> to vector<40x128xf32>
    %4 = arith.mulf %2, %3 : vector<40x128xf32>
    %c0_3 = arith.constant 0 : index
    %c0_4 = arith.constant 0 : index
    %5 = vector.load %arg3[%c0_3, %c0_4] : memref<40x1xf32, #tpu.memory_space<vmem>>, vector<40x1xf32>
    %6 = vector.broadcast %5 : vector<40x1xf32> to vector<40x128xf32>
    %7 = arith.addf %4, %6 : vector<40x128xf32>
    %cst = arith.constant 0.000000e+00 : f32
    %8 = vector.broadcast %cst : f32 to vector<40x128xf32>
    %9 = arith.maximumf %7, %8 : vector<40x128xf32>
    %c0_5 = arith.constant 0 : index
    %c0_6 = arith.constant 0 : index
    %10 = vector.load %arg4[%c0_5, %c0_6] : memref<40x40xf32, #tpu.memory_space<vmem>>, vector<40x40xf32>
    %cst_7 = arith.constant dense<0.000000e+00> : vector<40x128xf32>
    %11 = tpu.matmul %10, %9, %cst_7 {dimension_numbers = #tpu.dot_dimension_numbers<[1], [0], [0], [1], [0, 0, 1, 1], [], []>} : vector<40x40xf32>, vector<40x128xf32>, vector<40x128xf32> -> vector<40x128xf32>
    %c0_8 = arith.constant 0 : index
    %c0_9 = arith.constant 0 : index
    %12 = vector.load %arg5[%c0_8, %c0_9] : memref<40x1xf32, #tpu.memory_space<vmem>>, vector<40x1xf32>
    %13 = vector.broadcast %12 : vector<40x1xf32> to vector<40x128xf32>
    %14 = arith.addf %11, %13 : vector<40x128xf32>
    %cst_10 = arith.constant 0.000000e+00 : f32
    %15 = vector.broadcast %cst_10 : f32 to vector<40x128xf32>
    %16 = arith.maximumf %14, %15 : vector<40x128xf32>
    %c0_11 = arith.constant 0 : index
    %c0_12 = arith.constant 0 : index
    %17 = vector.load %arg6[%c0_11, %c0_12] : memref<40x1xf32, #tpu.memory_space<vmem>>, vector<40x1xf32>
    %18 = vector.broadcast %17 : vector<40x1xf32> to vector<40x128xf32>
    %19 = arith.mulf %18, %16 : vector<40x128xf32>
    %cst_13 = arith.constant dense<0.000000e+00> : vector<128xf32>
    %20 = vector.multi_reduction <add>, %19, %cst_13 [0] : vector<40x128xf32> to vector<128xf32>
    %21 = vector.shape_cast %20 : vector<128xf32> to vector<1x128xf32>
    %c0_14 = arith.constant 0 : index
    %c0_15 = arith.constant 0 : index
    %22 = vector.load %arg7[%c0_14, %c0_15] : memref<1x1xf32, #tpu.memory_space<vmem>>, vector<1x1xf32>
    %23 = vector.broadcast %22 : vector<1x1xf32> to vector<1x128xf32>
    %24 = arith.addf %21, %23 : vector<1x128xf32>
    %c0_16 = arith.constant 0 : index
    %c0_17 = arith.constant 0 : index
    %25 = vector.load %arg8[%c0_16, %c0_17] : memref<1x128xf32, #tpu.memory_space<vmem>>, vector<1x128xf32>
    tpu.vector_store %arg8[%c0_16, %c0_17], %24 {strides = array<i32>} : memref<1x128xf32, #tpu.memory_space<vmem>>, vector<1x128xf32>,
    return
  }
  func.func @transform_0(%arg0: i32) -> (i32, i32) {
    %c0_i32 = arith.constant 0 : i32
    %c0_i32_0 = arith.constant 0 : i32
    return %c0_i32, %arg0 : i32, i32
  }
  func.func @transform_1(%arg0: i32) -> (i32, i32) {
    %c0_i32 = arith.constant 0 : i32
    %c0_i32_0 = arith.constant 0 : i32
    %c0_i32_1 = arith.constant 0 : i32
    return %c0_i32, %c0_i32_0 : i32, i32
  }
  func.func @transform_2(%arg0: i32) -> (i32, i32) {
    %c0_i32 = arith.constant 0 : i32
    %c0_i32_0 = arith.constant 0 : i32
    %c0_i32_1 = arith.constant 0 : i32
    return %c0_i32, %c0_i32_0 : i32, i32
  }
  func.func @transform_3(%arg0: i32) -> (i32, i32) {
    %c0_i32 = arith.constant 0 : i32
    %c0_i32_0 = arith.constant 0 : i32
    %c0_i32_1 = arith.constant 0 : i32
    return %c0_i32, %c0_i32_0 : i32, i32
  }
  func.func @transform_4(%arg0: i32) -> (i32, i32) {
    %c0_i32 = arith.constant 0 : i32
    %c0_i32_0 = arith.constant 0 : i32
    %c0_i32_1 = arith.constant 0 : i32
    return %c0_i32, %c0_i32_0 : i32, i32
  }
  func.func @transform_5(%arg0: i32) -> (i32, i32) {
    %c0_i32 = arith.constant 0 : i32
    %c0_i32_0 = arith.constant 0 : i32
    %c0_i32_1 = arith.constant 0 : i32
    return %c0_i32, %c0_i32_0 : i32, i32
  }
  func.func @transform_6(%arg0: i32) -> (i32, i32) {
    %c0_i32 = arith.constant 0 : i32
    %c0_i32_0 = arith.constant 0 : i32
    %c0_i32_1 = arith.constant 0 : i32
    return %c0_i32, %c0_i32_0 : i32, i32
  }
  func.func @transform_7(%arg0: i32) -> (i32, i32) {
    %c0_i32 = arith.constant 0 : i32
    %c0_i32_0 = arith.constant 0 : i32
    return %c0_i32, %arg0 : i32, i32
  }
}

</mosaic_0001>

<bundles_post_ra>
// kernel: tpu_custom_call.1
= control target key start
LH: loop header
LB: loop body
LE: loop exit
PB: predicated region body
PF: predicated region fallthrough
CT: control target
= control target key end

     0   :  { %s562_s0 = inlined_call_operand.vmem [shape: f32[1,128], index: 0, kind: input, shape index: {}]   ;;  %s563_s1 = inlined_call_operand.vmem [shape: f32[40,1], index: 1, kind: input, shape index: {}]   ;;  %s564_s2 = inlined_call_operand.vmem [shape: f32[40,1], index: 2, kind: input, shape index: {}]   ;;  %s565_s3 = inlined_call_operand.vmem [shape: f32[40,40], index: 3, kind: input, shape index: {}]   ;;  %s566_s4 = inlined_call_operand.vmem [shape: f32[40,1], index: 4, kind: input, shape index: {}]   ;;  %s567_s5 = inlined_call_operand.vmem [shape: f32[40,1], index: 5, kind: input, shape index: {}]   ;;  %s568_s6 = inlined_call_operand.<no memory space> [shape: f32[1,1], index: 6, kind: input, shape index: {}]   ;;  %s569_s7 = inlined_call_operand.hbm [shape: f32[1,128], index: 7, kind: output, shape index: {}]  }
   0x1   :  { %v12_v0 = vstv %s568_s6 }
   0x2   :  { %13 = vst [vmem:[#allocation2] sm:$0x1] %v12_v0 }
   0x3   :  { %v71_v1 = vld [vmem:[%s564_s2] sm:$0xff]  ;;  %v412_v3 = vmov 0   ;;  %v72_v4 = vld [vmem:[%s564_s2 + $0x8] sm:$0xff]  ;;  %v33_v6 = vld [vmem:[%s563_s1 + $0x18] sm:$0xff] }
   0x4   :  { %v30_v2 = vld [vmem:[%s563_s1] sm:$0xff]  ;;  %387 = vset.pattern.permute.xlu1 %v412_v3  ;;  %386 = vset.pattern.permute.xlu0 %v412_v3  ;;  %v31_v5 = vld [vmem:[%s563_s1 + $0x8] sm:$0xff]  ;;  %v32_v7 = vld [vmem:[%s563_s1 + $0x10] sm:$0xff] }
   0x5   :  { %78 = vperm.xlu1 %387, %v71_v1   ;;  %37 = vperm.xlu0 %386, %v30_v2  }
   0x9   :  { %83 = vperm.xlu1 %387, %v72_v4   ;;  %42 = vperm.xlu0 %386, %v31_v5  }
   0xa   :  { %14 = vsyncpa [#allocation4], 0  ;;  %v74_v8 = vld [vmem:[%s564_s2 + $0x18] sm:$0xff]  ;;  %v73_v9 = vld [vmem:[%s564_s2 + $0x10] sm:$0xff]  ;;  %v413_v10 = vmov 0.0|0.0   ;;  %vm414_vm0 = vmmov 0  }
   0xb   :  { %369 = vmatprep.subr.bf16.mxu0 %v413_v10  ;;  %375 = vmatprep.subr.bf16.mxu1 %v413_v10  ;;  %v75_v11 = vld [vmem:[%s564_s2 + $0x20] sm:$0xff]  ;;  %v117_v13 = vld [vmem:[%s566_s4 + $0x8] sm:$0xff]  ;;  %v119_v15 = vld [vmem:[%s566_s4 + $0x18] sm:$0xff]  ;;  %v415_v17 = vmov 0.0   ;;  %vm146_vm1 = vcmask 326656  }
   0xc   :  { %v34_v12 = vld [vmem:[%s563_s1 + $0x20] sm:$0xff]  ;;  %v118_v16 = vld [vmem:[%s566_s4 + $0x10] sm:$0xff]  ;;  %354 = vmatprep.mubr.msk.f32.mxu0 %vm414_vm0, %v415_v17  ;;  %363 = vmatprep.mubr.msk.f32.mxu1 %vm414_vm0, %v415_v17  ;;  %v258_v18 = vld [vmem:[%s567_s5 + $0x8] sm:$0xff] }
   0xd   :  { %52 = vperm.xlu1 %387, %v33_v6   ;;  %47 = vperm.xlu0 %386, %v32_v7   ;;  %v116_v14 = vld [vmem:[%s566_s4] sm:$0xff]  ;;  %v259_v20 = vld [vmem:[%s567_s5 + $0x10] sm:$0xff]  ;;  %v260_v23 = vld [vmem:[%s567_s5 + $0x18] sm:$0xff] }
   0xe   :  { %v257_v19 = vld [vmem:[%s567_s5] sm:$0xff]  ;;  %v114_v54 = vld [vmem:[%s565_s3 + $0x18] sm:$0xff]  ;;  %v112_v55 = vld [vmem:[%s565_s3 + $0x8] sm:$0xff] }
   0xf   :  { %v120_v21 = vld [vmem:[%s566_s4 + $0x20] sm:$0xff]  ;;  %v113_v57 = vld [vmem:[%s565_s3 + $0x10] sm:$0xff] }
  0x10   :  { %v261_v22 = vld [vmem:[%s567_s5 + $0x20] sm:$0xff] }
  0x11   :  { %93 = vperm.xlu1 %387, %v74_v8   ;;  %88 = vperm.xlu0 %386, %v73_v9   ;;  %v302_v24 = vld [vmem:[#allocation2] sm:$0x1] }
  0x12   :  { %v328_v25 = vld [vmem:[%s562_s0] ss:$0 sm:$0xff] }
  0x13   :  { %v111_v53 = vld [vmem:[%s565_s3] sm:$0xff] }
  0x14   :  { %v115_v56 = vld [vmem:[%s565_s3 + $0x20] sm:$0xff]  ;;  %s416_s3 = smov [#allocation3]  }
  0x15   :  { %98 = vperm.xlu1 %387, %v75_v11   ;;  %57 = vperm.xlu0 %386, %v34_v12   ;;  %s320_s25 = sshll.u32 %s416_s3, 4  ;;  %s321_s25 = int_to_ptr.vmem [resolvable:$true] %s320_s25 }
  0x16   :  { %s388_s26 = scalar_lea.vmem %s321_s25, 16  ;;  %s392_s27 = scalar_lea.vmem %s321_s25, 32 }
  0x17   :  { %p389_p0 = scmp.ne.s32.totalorder %s321_s25, %s388_s26  ;;  %p393_p1 = scmp.lt.s32.totalorder %s321_s25, %s321_s25 }
  0x18   :  { %p394_p2 = scmp.lt.s32.totalorder %s392_s27, %s388_s26 }
  0x19   :  { %128 = vperm.xlu1 %387, %v117_v13   ;;  %123 = vperm.xlu0 %386, %v116_v14  }
  0x1a   :  { %p395_p3 = por %p394_p2, %p393_p1 }
  0x1c   :  { %p396_p4 = pnand %p395_p3, %p389_p0 }
  0x1d   :  { %138 = vperm.xlu1 %387, %v119_v15   ;;  %133 = vperm.xlu0 %386, %v118_v16  }
  0x21   :  { %269 = vperm.xlu1 %387, %v258_v18   ;;  %264 = vperm.xlu0 %386, %v257_v19  }
  0x25   :  { %274 = vperm.xlu1 %387, %v259_v20   ;;  %143 = vperm.xlu0 %386, %v120_v21  }
  0x29   :  { %284 = vperm.xlu1 %387, %v261_v22   ;;  %279 = vperm.xlu0 %386, %v260_v23  }
  0x2d   :  { %305 = vperm.xlu0 %386, %v302_v24  }
  0x84   :  { %v79_v26 = vpop.permute.xlu1 %78  ;;  %v38_v27 = vpop.permute.xlu0 %37 }
  0x85   :  { %v66_v28 = vmul.f32 %v328_v25, %v38_v27 }
  0x87   :  { %v101_v31 = vadd.f32 %v79_v26, %v66_v28 }
  0x88   :  { %v84_v29 = vpop.permute.xlu1 %83  ;;  %v43_v30 = vpop.permute.xlu0 %42 }
  0x89   :  { %v67_v32 = vmul.f32 %v328_v25, %v43_v30  ;;  %v106_v36 = vmax.f32 %v101_v31, 0.0 }
  0x8b   :  { %v102_v33 = vadd.f32 %v84_v29, %v67_v32  ;;  %v308_v32 = vlaneseq }
  0x8c   :  { %v53_v34 = vpop.permute.xlu1 %52  ;;  %v48_v35 = vpop.permute.xlu0 %47 }
  0x8d   :  { %v107_v37 = vmax.f32 %v102_v33, 0.0  ;;  %v69_v38 = vmul.f32 %v328_v25, %v53_v34  ;;  %v68_v39 = vmul.f32 %v328_v25, %v48_v35  ;;  %v309_v35 = vshrl.u32 %v308_v32, 7 }
  0x8f   :  { %v370_v40 = vpack.c.bf16 %v107_v37, %v106_v36 }
  0x90   :  { %v94_v41 = vpop.permute.xlu1 %93  ;;  %v89_v42 = vpop.permute.xlu0 %88 }
  0x91   :  { %v104_v43 = vadd.f32 %v94_v41, %v69_v38  ;;  %v103_v44 = vadd.f32 %v89_v42, %v68_v39  ;;  %371 = vmatpush3.bf16.msra.mxu0 %v370_v40  ;;  %378 = vmatpush3.bf16.msra.mxu1 %v370_v40  ;;  %v310_v38 = vsub.s32 0, %v309_v35 }
  0x92   :  { %372 = vmatprep.subr.bf16.mxu0 %v413_v10  ;;  %376 = vmatprep.subr.bf16.mxu1 %v413_v10 }
  0x93   :  { %v109_v45 = vmax.f32 %v104_v43, 0.0  ;;  %v108_v46 = vmax.f32 %v103_v44, 0.0 }
  0x94   :  { %v58_v47 = vpop.permute.xlu0 %57  ;;  %v99_v50 = vpop.permute.xlu1 %98 }
  0x95   :  { %v373_v48 = vpack.c.bf16 %v109_v45, %v108_v46  ;;  %v70_v49 = vmul.f32 %v328_v25, %v58_v47 }
  0x97   :  { %v105_v51 = vadd.f32 %v99_v50, %v70_v49  ;;  %374 = vmatpush3.bf16.msra.mxu0 %v373_v48  ;;  %379 = vmatpush3.bf16.msra.mxu1 %v373_v48 }
  0x98   :  { %352 = vmatprep.subr.mxu0 %v415_v17  ;;  %377 = vmatprep.subr.mxu1 %v415_v17  ;;  %v124_v58 = vpop.permute.xlu0 %123  ;;  %v129_v59 = vpop.permute.xlu1 %128 }
  0x99   :  { %v110_v52 = vmax.f32 %v105_v51, 0.0 }
  0x9b   :  { %353 = vmatpush3.msra.mxu0 %v110_v52  ;;  %380 = vmatpush3.msra.mxu1 %v110_v52 }
  0x9c   :  { %355 = vmatmul.mubr.msk.f32.vlgmr.msra.gmra.mrb[0].mxu0 %vm146_vm1, %v111_v53  ;;  %364 = vmatmul.mubr.msk.f32.vlgmr.msra.gmra.mrb[0].mxu1 %vm146_vm1, %v114_v54  ;;  %v134_v60 = vpop.permute.xlu0 %133  ;;  %v139_v61 = vpop.permute.xlu1 %138 }
  0x9d   :  { %357 = vmatprep.mubr.msk.f32.mxu0 %vm414_vm0, %v415_v17  ;;  %366 = vmatprep.mubr.msk.f32.mxu1 %vm414_vm0, %v415_v17 }
  0xa0   :  { %358 = vmatmul.mubr.msk.f32.gmra.mrb[2].mxu0 %vm146_vm1, %v112_v55  ;;  %367 = vmatmul.mubr.msk.f32.gmra.mrb[2].mxu1 %vm146_vm1, %v115_v56  ;;  %v265_v3 = vpop.permute.xlu0 %264  ;;  %v270_v4 = vpop.permute.xlu1 %269 }
  0xa1   :  { %360 = vmatprep.mubr.msk.f32.mxu0 %vm414_vm0, %v415_v17 }
  0xa4   :  { %361 = vmatmul.mubr.msk.f32.gmra.mrb[4].mxu0 %vm146_vm1, %v113_v57  ;;  %v144_v13 = vpop.permute.xlu0 %143  ;;  %v275_v20 = vpop.permute.xlu1 %274 }
  0xa8   :  { %v280_v26 = vpop.permute.xlu0 %279  ;;  %v285_v29 = vpop.permute.xlu1 %284 }
  0xac   :  { %v306_v40 = vpop.permute.xlu0 %305 }
  0xad   :  { %v311_v42 = vrot.slane %v306_v40, %v310_v38 }
 0x16f   :  { %v228_v62 = vpop.f32.mrb[0].mxu0  ;;  %v243_v63 = vpop.f32.mrb[0].mxu1 }
 0x170   :  { %v229_v0 = vadd.f32 %v228_v62, %v124_v58  ;;  %v356_v1 = vpop.f32.mrb[1].mxu0  ;;  %v365_v2 = vpop.f32.mrb[1].mxu1  ;;  %v244_v11 = vadd.f32 %v243_v63, %v139_v61 }
 0x172   :  { %v252_v7 = vmax.f32 %v229_v0, 0.0  ;;  %v255_v21 = vmax.f32 %v244_v11, 0.0 }
 0x173   :  { %v233_v5 = vpop.f32.mrb[2].mxu0  ;;  %v248_v6 = vpop.f32.mrb[2].mxu1 }
 0x174   :  { %v234_v8 = vadd.f32 %v233_v5, %v129_v59  ;;  %v359_v9 = vpop.f32.mrb[3].mxu0  ;;  %v368_v10 = vpop.f32.mrb[3].mxu1  ;;  %v287_v15 = vmul.f32 %v265_v3, %v252_v7  ;;  %v249_v17 = vadd.f32 %v248_v6, %v144_v13  ;;  %v290_v27 = vmul.f32 %v280_v26, %v255_v21 }
 0x176   :  { %v253_v12 = vmax.f32 %v234_v8, 0.0  ;;  %v256_v24 = vmax.f32 %v249_v17, 0.0 }
 0x177   :  { %v238_v14 = vpop.f32.mrb[4].mxu0 }
 0x178   :  { %v288_v16 = vmul.f32 %v270_v4, %v253_v12  ;;  %v239_v18 = vadd.f32 %v238_v14, %v134_v60  ;;  %v362_v19 = vpop.f32.mrb[5].mxu0  ;;  %v291_v30 = vmul.f32 %v285_v29, %v256_v24 }
 0x17a   :  { %v292_v22 = vadd.f32 %v288_v16, %v287_v15  ;;  %v254_v23 = vmax.f32 %v239_v18, 0.0 }
 0x17c   :  { %v289_v25 = vmul.f32 %v275_v20, %v254_v23 }
 0x17e   :  { %v293_v28 = vadd.f32 %v292_v22, %v289_v25 }
 0x180   :  { %v294_v31 = vadd.f32 %v293_v28, %v290_v27 }
 0x182   :  { %v295_v33 = vadd.f32 %v294_v31, %v291_v30 }
 0x184   :  { %v296_v34 = vrot.slane %v295_v33, 4 }
 0x186   :  { %v297_v36 = vadd.f32 %v296_v34, %v295_v33 }
 0x188   :  { %v298_v37 = vrot.slane %v297_v36, 2 }
 0x18a   :  { %v299_v39 = vadd.f32 %v298_v37, %v297_v36 }
 0x18c   :  { %v300_v41 = vrot.slane %v299_v39, 1 }
 0x18e   :  { %v301_v43 = vadd.f32 %v300_v41, %v299_v39 }
 0x190   :  { %v312_v44 = vadd.f32 %v311_v42, %v301_v43 }
 0x192   :  { %313 = vst [vmem:[#allocation3] sm:$0x1] %v312_v44 }
 0x193   :  { %399 = shalt.err (!%p396_p4)
}
 0x194   :  { %s400_s1 = scalar_lea.hbm %s569_s7, 16 }
 0x195   :  { %p401_p5 = scmp.ne.s32.totalorder %s569_s7, %s400_s1  ;;  %p404_p6 = scmp.lt.u32.totalorder %s400_s1, %s569_s7 }
 0x197   :  { %p406_p7 = pnand %p404_p6, %p401_p5 }
 0x199   :  { %409 = shalt.err (!%p406_p7)
}
 0x19a   :  { %323 = dma.vmem_to_hbm [thread:$0]  %s321_s25, 16, %s569_s7, [#allocation4]  }
 0x19b   :  { %410 = dma.done.wait [#allocation4], 16  }
 0x19c   :  { %411 = vsyncadd [#allocation4], 4294967280 }
 0x19d   :  { %327 = vsyncpa [#allocation4], 1 }

</bundles_post_ra>
